<compile_context>
chip_gen: v7x
topology: tpu7x:2x2x1
jax: 0.10.0
libtpu: 0.0.40
codegen_flags: <defaults>
</compile_context>

<pallas_src>
import functools

import jax
import jax.numpy as jnp
from jax.experimental import pallas as pl
from jax.experimental.pallas import tpu as pltpu

_VMEM_BUDGET = 40 * 1024 * 1024      # in-kernel working-set budget (safe on v5e/v6e/v7x)
_VMEM_LIMIT = 48 * 1024 * 1024       # scoped-VMEM request passed to the compiler
_MAX_LANE_FOLD = 64                  # max number of 128-lane chunks folded with unrolled adds


def _lane_fold(col, L):
    """Fold a (1, L) f32 row of partial sums into (1, 128) per-lane partials."""
    if L % 128 == 0 and (L // 128) <= _MAX_LANE_FOLD:
        acc = col[:, :128]
        for k in range(1, L // 128):           # 128-aligned slices: cheap lane-dense adds
            acc = acc + col[:, k * 128:(k + 1) * 128]
        return acc
    # Fallback (L not a 128-multiple or very large): full reduce, value kept in lane 0
    # only so the wrapper-side lane sum stays correct.
    lane = jax.lax.broadcasted_iota(jnp.int32, (1, 128), 1)
    return jnp.where(lane == 0, jnp.sum(col), 0.0)


def _tv3d_kernel(x_ref, md_ref, mh_ref, mw_ref, out_ref, *, D, H, W):
    HW = H * W
    L = D * HW
    x = x_ref[...]                              # (nt, L), native input dtype

    def term(offset, mask):
        # Forward neighbour x[i + offset] via a lane rotation (XLU slot); wrap and
        # boundary-crossing positions are zeroed by the {0,1} mask.
        xn = pltpu.roll(x, shift=L - offset, axis=1)
        d = (xn - x).astype(jnp.float32)        # diff in input dtype; square/accum in f32
        sq = d * d * mask                       # mask: (1, L) f32, broadcast over rows
        col = jnp.sum(sq, axis=0, keepdims=True)    # sublane (row) reduction -> (1, L)
        return _lane_fold(col, L)                   # (1, 128) per-lane partial sums

    zero = jnp.zeros((1, 128), jnp.float32)
    d_p = term(HW, md_ref[...]) if D > 1 else zero
    h_p = term(W, mh_ref[...]) if H > 1 else zero
    w_p = term(1, mw_ref[...]) if W > 1 else zero
    out_ref[...] = jnp.concatenate([d_p, h_p, w_p], axis=0)   # lane-dense (3, 128) store


def _pick_rows(n_rows, row_elems, itemsize):
    """Volumes per grid step, budgeted on the f32 working set inside the kernel."""
    pack = 8 * max(1, 4 // itemsize)               # sublane packing: 8 f32 / 16 bf16 / 32 i8
    per_row = row_elems * (4 * 4 + 3 * itemsize)   # f32 roll/diff/sq temps + buffered input
    fixed = 3 * row_elems * 4 * 2 + (256 << 10)    # masks (double-buffered) + slack
    max_rows = (_VMEM_BUDGET - fixed) // per_row
    if max_rows < 1:
        # TODO(synk): tile the flattened D*H*W axis at plane boundaries with a one-plane
        # carry for single volumes too large to fit one VMEM block.
        raise NotImplementedError(
            f"TVLoss3D: volume of D*H*W={row_elems} elements does not fit one VMEM block.")
    rows = min(int(max_rows), n_rows)
    if n_rows >= 2:
        # >=2 grid steps so the v7x megacore can shard the (parallel) grid axis.
        rows = min(rows, -(-n_rows // 2))
    if rows >= pack:
        rows = (rows // pack) * pack               # keep sub-32-bit sublane packing intact
    return max(int(rows), 1)


@functools.partial(jax.jit, static_argnames=("w",))
def tv_loss_3d(x, w=(3.0, 1.0, 1.0)):
    """TVLoss3D forward. x: (B, C, D, H, W)."""
    B, C, D, H, W = x.shape
    N = B * C
    HW = H * W
    L = D * HW

    nt = _pick_rows(N, L, x.dtype.itemsize)
    G = -(-N // nt)
    Np = G * nt

    x2d = x.reshape(N, L)
    if Np != N:
        # Zero-padded rows contribute exactly zero to every TV term.
        x2d = jnp.pad(x2d, ((0, Np - N), (0, 0)))
    x3d = x2d.reshape(G, nt, L)

    # Boundary masks over the flattened (D, H, W) index, built once in the wrapper
    # (keeps integer modulo out of the kernel; the kernel multiplies them in).
    idx = jnp.arange(L, dtype=jnp.int32)
    mask_d = (idx < (D - 1) * HW).astype(jnp.float32).reshape(1, L)
    mask_h = ((idx % HW) < (H - 1) * W).astype(jnp.float32).reshape(1, L)
    mask_w = ((idx % W) < (W - 1)).astype(jnp.float32).reshape(1, L)

    kernel = functools.partial(_tv3d_kernel, D=D, H=H, W=W)

    partials = pl.pallas_call(
        kernel,
        out_shape=jax.ShapeDtypeStruct((G, 3, 128), jnp.float32),
        grid=(G,),
        in_specs=[
            pl.BlockSpec((None, nt, L), lambda g: (g, 0, 0)),
            pl.BlockSpec((1, L), lambda g: (0, 0)),
            pl.BlockSpec((1, L), lambda g: (0, 0)),
            pl.BlockSpec((1, L), lambda g: (0, 0)),
        ],
        out_specs=pl.BlockSpec((None, 3, 128), lambda g: (g, 0, 0)),
        compiler_params=pltpu.CompilerParams(
            dimension_semantics=("parallel",),
            vmem_limit_bytes=_VMEM_LIMIT,
        ),
        cost_estimate=pl.CostEstimate(
            flops=12 * Np * L,
            transcendentals=0,
            bytes_accessed=Np * L * x.dtype.itemsize + 3 * L * 4 + G * 3 * 128 * 4,
        ),
    )(x3d, mask_d, mask_h, mask_w)

    d_tv = jnp.sum(partials[:, 0, :])
    h_tv = jnp.sum(partials[:, 1, :])
    w_tv = jnp.sum(partials[:, 2, :])

    # Exact reference normalization (degenerate dims give 0/0 = NaN, same as PyTorch).
    count_d = H * W * (D - 1) * C * B
    count_h = (H - 1) * W * D * C * B
    count_w = H * (W - 1) * D * C * B

    return w[0] * d_tv / count_d + w[1] * h_tv / count_h + w[2] * w_tv / count_w


if __name__ == "__main__":
    key = jax.random.PRNGKey(0)
    B, C, D, H, W = 2, 4, 8, 16, 16
    x = jax.random.normal(key, (B, C, D, H, W), dtype=jnp.float32)

    out = jax.block_until_ready(tv_loss_3d(x))

    # Pure-JAX reference (same math as the PyTorch module).
    d_tv_ref = jnp.sum((x[:, :, 1:] - x[:, :, :-1]) ** 2)
    h_tv_ref = jnp.sum((x[:, :, :, 1:] - x[:, :, :, :-1]) ** 2)
    w_tv_ref = jnp.sum((x[:, :, :, :, 1:] - x[:, :, :, :, :-1]) ** 2)
    count_d = H * W * (D - 1) * C * B
    count_h = (H - 1) * W * D * C * B
    count_w = H * (W - 1) * D * C * B
    ref = 3.0 * d_tv_ref / count_d + 1.0 * h_tv_ref / count_h + 1.0 * w_tv_ref / count_w

    assert jnp.allclose(out, ref, rtol=1e-5, atol=1e-5), (out, ref)
    print("KERNEL_OK")
</pallas_src>

<mosaic_0001>
module attributes {stable_mosaic.version = 11 : i64} {
  func.func @_tv3d_kernel(%arg0: i32, %arg1: memref<1x4x2048xf32, #tpu.memory_space<vmem>>, %arg2: memref<1x2048xf32, #tpu.memory_space<vmem>>, %arg3: memref<1x2048xf32, #tpu.memory_space<vmem>>, %arg4: memref<1x2048xf32, #tpu.memory_space<vmem>>, %arg5: memref<1x3x128xf32, #tpu.memory_space<vmem>>) attributes {dimension_semantics = [#tpu.dimension_semantics<parallel>], iteration_bounds = array<i64: 2>, scalar_prefetch = 0 : i64, scratch_operands = 0 : i64, tpu.core_type = #tpu.core_type<tc>, window_params = [{transform_indices = @transform_0, window_bounds = array<i64: 1, 4, 2048>}, {pipeline_mode = #tpu.pipeline_mode<synchronous>, transform_indices = @transform_1, window_bounds = array<i64: 1, 2048>}, {pipeline_mode = #tpu.pipeline_mode<synchronous>, transform_indices = @transform_2, window_bounds = array<i64: 1, 2048>}, {pipeline_mode = #tpu.pipeline_mode<synchronous>, transform_indices = @transform_3, window_bounds = array<i64: 1, 2048>}, {transform_indices = @transform_4, window_bounds = array<i64: 1, 3, 128>}]} {
    %c0 = arith.constant 0 : index
    %c0_0 = arith.constant 0 : index
    %c0_1 = arith.constant 0 : index
    %0 = vector.load %arg1[%c0, %c0_0, %c0_1] : memref<1x4x2048xf32, #tpu.memory_space<vmem>>, vector<1x4x2048xf32>
    %1 = vector.shape_cast %0 : vector<1x4x2048xf32> to vector<4x2048xf32>
    %c0_2 = arith.constant 0 : index
    %c0_3 = arith.constant 0 : index
    %2 = vector.load %arg2[%c0_2, %c0_3] : memref<1x2048xf32, #tpu.memory_space<vmem>>, vector<1x2048xf32>
    %c1792_i32 = arith.constant 1792 : i32
    %3 = tpu.dynamic_rotate %1 by %c1792_i32 dim 1 : vector<4x2048xf32>, i32 -> vector<4x2048xf32>
    %4 = arith.subf %3, %1 : vector<4x2048xf32>
    %5 = arith.mulf %4, %4 : vector<4x2048xf32>
    %6 = vector.broadcast %2 : vector<1x2048xf32> to vector<4x2048xf32>
    %7 = arith.mulf %5, %6 : vector<4x2048xf32>
    %cst = arith.constant dense<0.000000e+00> : vector<2048xf32>
    %8 = vector.multi_reduction <add>, %7, %cst [0] : vector<4x2048xf32> to vector<2048xf32>
    %9 = vector.shape_cast %8 : vector<2048xf32> to vector<1x2048xf32>
    %10 = vector.extract_strided_slice %9 {offsets = [0, 0], sizes = [1, 128], strides = [1, 1]} : vector<1x2048xf32> to vector<1x128xf32>
    %11 = vector.extract_strided_slice %9 {offsets = [0, 128], sizes = [1, 128], strides = [1, 1]} : vector<1x2048xf32> to vector<1x128xf32>
    %12 = arith.addf %10, %11 : vector<1x128xf32>
    %13 = vector.extract_strided_slice %9 {offsets = [0, 256], sizes = [1, 128], strides = [1, 1]} : vector<1x2048xf32> to vector<1x128xf32>
    %14 = arith.addf %12, %13 : vector<1x128xf32>
    %15 = vector.extract_strided_slice %9 {offsets = [0, 384], sizes = [1, 128], strides = [1, 1]} : vector<1x2048xf32> to vector<1x128xf32>
    %16 = arith.addf %14, %15 : vector<1x128xf32>
    %17 = vector.extract_strided_slice %9 {offsets = [0, 512], sizes = [1, 128], strides = [1, 1]} : vector<1x2048xf32> to vector<1x128xf32>
    %18 = arith.addf %16, %17 : vector<1x128xf32>
    %19 = vector.extract_strided_slice %9 {offsets = [0, 640], sizes = [1, 128], strides = [1, 1]} : vector<1x2048xf32> to vector<1x128xf32>
    %20 = arith.addf %18, %19 : vector<1x128xf32>
    %21 = vector.extract_strided_slice %9 {offsets = [0, 768], sizes = [1, 128], strides = [1, 1]} : vector<1x2048xf32> to vector<1x128xf32>
    %22 = arith.addf %20, %21 : vector<1x128xf32>
    %23 = vector.extract_strided_slice %9 {offsets = [0, 896], sizes = [1, 128], strides = [1, 1]} : vector<1x2048xf32> to vector<1x128xf32>
    %24 = arith.addf %22, %23 : vector<1x128xf32>
    %25 = vector.extract_strided_slice %9 {offsets = [0, 1024], sizes = [1, 128], strides = [1, 1]} : vector<1x2048xf32> to vector<1x128xf32>
    %26 = arith.addf %24, %25 : vector<1x128xf32>
    %27 = vector.extract_strided_slice %9 {offsets = [0, 1152], sizes = [1, 128], strides = [1, 1]} : vector<1x2048xf32> to vector<1x128xf32>
    %28 = arith.addf %26, %27 : vector<1x128xf32>
    %29 = vector.extract_strided_slice %9 {offsets = [0, 1280], sizes = [1, 128], strides = [1, 1]} : vector<1x2048xf32> to vector<1x128xf32>
    %30 = arith.addf %28, %29 : vector<1x128xf32>
    %31 = vector.extract_strided_slice %9 {offsets = [0, 1408], sizes = [1, 128], strides = [1, 1]} : vector<1x2048xf32> to vector<1x128xf32>
    %32 = arith.addf %30, %31 : vector<1x128xf32>
    %33 = vector.extract_strided_slice %9 {offsets = [0, 1536], sizes = [1, 128], strides = [1, 1]} : vector<1x2048xf32> to vector<1x128xf32>
    %34 = arith.addf %32, %33 : vector<1x128xf32>
    %35 = vector.extract_strided_slice %9 {offsets = [0, 1664], sizes = [1, 128], strides = [1, 1]} : vector<1x2048xf32> to vector<1x128xf32>
    %36 = arith.addf %34, %35 : vector<1x128xf32>
    %37 = vector.extract_strided_slice %9 {offsets = [0, 1792], sizes = [1, 128], strides = [1, 1]} : vector<1x2048xf32> to vector<1x128xf32>
    %38 = arith.addf %36, %37 : vector<1x128xf32>
    %39 = vector.extract_strided_slice %9 {offsets = [0, 1920], sizes = [1, 128], strides = [1, 1]} : vector<1x2048xf32> to vector<1x128xf32>
    %40 = arith.addf %38, %39 : vector<1x128xf32>
    %c0_4 = arith.constant 0 : index
    %c0_5 = arith.constant 0 : index
    %41 = vector.load %arg3[%c0_4, %c0_5] : memref<1x2048xf32, #tpu.memory_space<vmem>>, vector<1x2048xf32>
    %c2032_i32 = arith.constant 2032 : i32
    %42 = tpu.dynamic_rotate %1 by %c2032_i32 dim 1 : vector<4x2048xf32>, i32 -> vector<4x2048xf32>
    %43 = arith.subf %42, %1 : vector<4x2048xf32>
    %44 = arith.mulf %43, %43 : vector<4x2048xf32>
    %45 = vector.broadcast %41 : vector<1x2048xf32> to vector<4x2048xf32>
    %46 = arith.mulf %44, %45 : vector<4x2048xf32>
    %cst_6 = arith.constant dense<0.000000e+00> : vector<2048xf32>
    %47 = vector.multi_reduction <add>, %46, %cst_6 [0] : vector<4x2048xf32> to vector<2048xf32>
    %48 = vector.shape_cast %47 : vector<2048xf32> to vector<1x2048xf32>
    %49 = vector.extract_strided_slice %48 {offsets = [0, 0], sizes = [1, 128], strides = [1, 1]} : vector<1x2048xf32> to vector<1x128xf32>
    %50 = vector.extract_strided_slice %48 {offsets = [0, 128], sizes = [1, 128], strides = [1, 1]} : vector<1x2048xf32> to vector<1x128xf32>
    %51 = arith.addf %49, %50 : vector<1x128xf32>
    %52 = vector.extract_strided_slice %48 {offsets = [0, 256], sizes = [1, 128], strides = [1, 1]} : vector<1x2048xf32> to vector<1x128xf32>
    %53 = arith.addf %51, %52 : vector<1x128xf32>
    %54 = vector.extract_strided_slice %48 {offsets = [0, 384], sizes = [1, 128], strides = [1, 1]} : vector<1x2048xf32> to vector<1x128xf32>
    %55 = arith.addf %53, %54 : vector<1x128xf32>
    %56 = vector.extract_strided_slice %48 {offsets = [0, 512], sizes = [1, 128], strides = [1, 1]} : vector<1x2048xf32> to vector<1x128xf32>
    %57 = arith.addf %55, %56 : vector<1x128xf32>
    %58 = vector.extract_strided_slice %48 {offsets = [0, 640], sizes = [1, 128], strides = [1, 1]} : vector<1x2048xf32> to vector<1x128xf32>
    %59 = arith.addf %57, %58 : vector<1x128xf32>
    %60 = vector.extract_strided_slice %48 {offsets = [0, 768], sizes = [1, 128], strides = [1, 1]} : vector<1x2048xf32> to vector<1x128xf32>
    %61 = arith.addf %59, %60 : vector<1x128xf32>
    %62 = vector.extract_strided_slice %48 {offsets = [0, 896], sizes = [1, 128], strides = [1, 1]} : vector<1x2048xf32> to vector<1x128xf32>
    %63 = arith.addf %61, %62 : vector<1x128xf32>
    %64 = vector.extract_strided_slice %48 {offsets = [0, 1024], sizes = [1, 128], strides = [1, 1]} : vector<1x2048xf32> to vector<1x128xf32>
    %65 = arith.addf %63, %64 : vector<1x128xf32>
    %66 = vector.extract_strided_slice %48 {offsets = [0, 1152], sizes = [1, 128], strides = [1, 1]} : vector<1x2048xf32> to vector<1x128xf32>
    %67 = arith.addf %65, %66 : vector<1x128xf32>
    %68 = vector.extract_strided_slice %48 {offsets = [0, 1280], sizes = [1, 128], strides = [1, 1]} : vector<1x2048xf32> to vector<1x128xf32>
    %69 = arith.addf %67, %68 : vector<1x128xf32>
    %70 = vector.extract_strided_slice %48 {offsets = [0, 1408], sizes = [1, 128], strides = [1, 1]} : vector<1x2048xf32> to vector<1x128xf32>
    %71 = arith.addf %69, %70 : vector<1x128xf32>
    %72 = vector.extract_strided_slice %48 {offsets = [0, 1536], sizes = [1, 128], strides = [1, 1]} : vector<1x2048xf32> to vector<1x128xf32>
    %73 = arith.addf %71, %72 : vector<1x128xf32>
    %74 = vector.extract_strided_slice %48 {offsets = [0, 1664], sizes = [1, 128], strides = [1, 1]} : vector<1x2048xf32> to vector<1x128xf32>
    %75 = arith.addf %73, %74 : vector<1x128xf32>
    %76 = vector.extract_strided_slice %48 {offsets = [0, 1792], sizes = [1, 128], strides = [1, 1]} : vector<1x2048xf32> to vector<1x128xf32>
    %77 = arith.addf %75, %76 : vector<1x128xf32>
    %78 = vector.extract_strided_slice %48 {offsets = [0, 1920], sizes = [1, 128], strides = [1, 1]} : vector<1x2048xf32> to vector<1x128xf32>
    %79 = arith.addf %77, %78 : vector<1x128xf32>
    %c0_7 = arith.constant 0 : index
    %c0_8 = arith.constant 0 : index
    %80 = vector.load %arg4[%c0_7, %c0_8] : memref<1x2048xf32, #tpu.memory_space<vmem>>, vector<1x2048xf32>
    %c2047_i32 = arith.constant 2047 : i32
    %81 = tpu.dynamic_rotate %1 by %c2047_i32 dim 1 : vector<4x2048xf32>, i32 -> vector<4x2048xf32>
    %82 = arith.subf %81, %1 : vector<4x2048xf32>
    %83 = arith.mulf %82, %82 : vector<4x2048xf32>
    %84 = vector.broadcast %80 : vector<1x2048xf32> to vector<4x2048xf32>
    %85 = arith.mulf %83, %84 : vector<4x2048xf32>
    %cst_9 = arith.constant dense<0.000000e+00> : vector<2048xf32>
    %86 = vector.multi_reduction <add>, %85, %cst_9 [0] : vector<4x2048xf32> to vector<2048xf32>
    %87 = vector.shape_cast %86 : vector<2048xf32> to vector<1x2048xf32>
    %88 = vector.extract_strided_slice %87 {offsets = [0, 0], sizes = [1, 128], strides = [1, 1]} : vector<1x2048xf32> to vector<1x128xf32>
    %89 = vector.extract_strided_slice %87 {offsets = [0, 128], sizes = [1, 128], strides = [1, 1]} : vector<1x2048xf32> to vector<1x128xf32>
    %90 = arith.addf %88, %89 : vector<1x128xf32>
    %91 = vector.extract_strided_slice %87 {offsets = [0, 256], sizes = [1, 128], strides = [1, 1]} : vector<1x2048xf32> to vector<1x128xf32>
    %92 = arith.addf %90, %91 : vector<1x128xf32>
    %93 = vector.extract_strided_slice %87 {offsets = [0, 384], sizes = [1, 128], strides = [1, 1]} : vector<1x2048xf32> to vector<1x128xf32>
    %94 = arith.addf %92, %93 : vector<1x128xf32>
    %95 = vector.extract_strided_slice %87 {offsets = [0, 512], sizes = [1, 128], strides = [1, 1]} : vector<1x2048xf32> to vector<1x128xf32>
    %96 = arith.addf %94, %95 : vector<1x128xf32>
    %97 = vector.extract_strided_slice %87 {offsets = [0, 640], sizes = [1, 128], strides = [1, 1]} : vector<1x2048xf32> to vector<1x128xf32>
    %98 = arith.addf %96, %97 : vector<1x128xf32>
    %99 = vector.extract_strided_slice %87 {offsets = [0, 768], sizes = [1, 128], strides = [1, 1]} : vector<1x2048xf32> to vector<1x128xf32>
    %100 = arith.addf %98, %99 : vector<1x128xf32>
    %101 = vector.extract_strided_slice %87 {offsets = [0, 896], sizes = [1, 128], strides = [1, 1]} : vector<1x2048xf32> to vector<1x128xf32>
    %102 = arith.addf %100, %101 : vector<1x128xf32>
    %103 = vector.extract_strided_slice %87 {offsets = [0, 1024], sizes = [1, 128], strides = [1, 1]} : vector<1x2048xf32> to vector<1x128xf32>
    %104 = arith.addf %102, %103 : vector<1x128xf32>
    %105 = vector.extract_strided_slice %87 {offsets = [0, 1152], sizes = [1, 128], strides = [1, 1]} : vector<1x2048xf32> to vector<1x128xf32>
    %106 = arith.addf %104, %105 : vector<1x128xf32>
    %107 = vector.extract_strided_slice %87 {offsets = [0, 1280], sizes = [1, 128], strides = [1, 1]} : vector<1x2048xf32> to vector<1x128xf32>
    %108 = arith.addf %106, %107 : vector<1x128xf32>
    %109 = vector.extract_strided_slice %87 {offsets = [0, 1408], sizes = [1, 128], strides = [1, 1]} : vector<1x2048xf32> to vector<1x128xf32>
    %110 = arith.addf %108, %109 : vector<1x128xf32>
    %111 = vector.extract_strided_slice %87 {offsets = [0, 1536], sizes = [1, 128], strides = [1, 1]} : vector<1x2048xf32> to vector<1x128xf32>
    %112 = arith.addf %110, %111 : vector<1x128xf32>
    %113 = vector.extract_strided_slice %87 {offsets = [0, 1664], sizes = [1, 128], strides = [1, 1]} : vector<1x2048xf32> to vector<1x128xf32>
    %114 = arith.addf %112, %113 : vector<1x128xf32>
    %115 = vector.extract_strided_slice %87 {offsets = [0, 1792], sizes = [1, 128], strides = [1, 1]} : vector<1x2048xf32> to vector<1x128xf32>
    %116 = arith.addf %114, %115 : vector<1x128xf32>
    %117 = vector.extract_strided_slice %87 {offsets = [0, 1920], sizes = [1, 128], strides = [1, 1]} : vector<1x2048xf32> to vector<1x128xf32>
    %118 = arith.addf %116, %117 : vector<1x128xf32>
    %119 = tpu.concatenate %40, %79, %118 in 0 : vector<1x128xf32>, vector<1x128xf32>, vector<1x128xf32> -> vector<3x128xf32>
    %c0_10 = arith.constant 0 : index
    %c0_11 = arith.constant 0 : index
    %c0_12 = arith.constant 0 : index
    %120 = vector.load %arg5[%c0_10, %c0_11, %c0_12] : memref<1x3x128xf32, #tpu.memory_space<vmem>>, vector<1x3x128xf32>
    %121 = vector.shape_cast %120 : vector<1x3x128xf32> to vector<3x128xf32>
    %122 = vector.shape_cast %119 : vector<3x128xf32> to vector<1x3x128xf32>
    tpu.vector_store %arg5[%c0_10, %c0_11, %c0_12], %122 {strides = array<i32>} : memref<1x3x128xf32, #tpu.memory_space<vmem>>, vector<1x3x128xf32>,
    return
  }
  func.func @transform_0(%arg0: i32) -> (i32, i32, i32) {
    %c0_i32 = arith.constant 0 : i32
    %c0_i32_0 = arith.constant 0 : i32
    %c0_i32_1 = arith.constant 0 : i32
    return %arg0, %c0_i32, %c0_i32_0 : i32, i32, i32
  }
  func.func @transform_1(%arg0: i32) -> (i32, i32) {
    %c0_i32 = arith.constant 0 : i32
    %c0_i32_0 = arith.constant 0 : i32
    %c0_i32_1 = arith.constant 0 : i32
    return %c0_i32, %c0_i32_0 : i32, i32
  }
  func.func @transform_2(%arg0: i32) -> (i32, i32) {
    %c0_i32 = arith.constant 0 : i32
    %c0_i32_0 = arith.constant 0 : i32
    %c0_i32_1 = arith.constant 0 : i32
    return %c0_i32, %c0_i32_0 : i32, i32
  }
  func.func @transform_3(%arg0: i32) -> (i32, i32) {
    %c0_i32 = arith.constant 0 : i32
    %c0_i32_0 = arith.constant 0 : i32
    %c0_i32_1 = arith.constant 0 : i32
    return %c0_i32, %c0_i32_0 : i32, i32
  }
  func.func @transform_4(%arg0: i32) -> (i32, i32, i32) {
    %c0_i32 = arith.constant 0 : i32
    %c0_i32_0 = arith.constant 0 : i32
    %c0_i32_1 = arith.constant 0 : i32
    return %arg0, %c0_i32, %c0_i32_0 : i32, i32, i32
  }
}

</mosaic_0001>

<bundles_post_ra>
// kernel: tv_loss_3d.1
= control target key start
LH: loop header
LB: loop body
LE: loop exit
PB: predicated region body
PF: predicated region fallthrough
CT: control target
= control target key end

     0   :  { %s1230_s15 = smov 0   ;;  %s1854_s0 = inlined_call_operand.vmem [shape: f32[2,4,2048], index: 0, kind: input, shape index: {}]   ;;  %s1855_s1 = inlined_call_operand.vmem [shape: f32[1,2048], index: 1, kind: input, shape index: {}]   ;;  %s1856_s2 = inlined_call_operand.vmem [shape: f32[1,2048], index: 2, kind: input, shape index: {}]   ;;  %s1857_s3 = inlined_call_operand.vmem [shape: f32[1,2048], index: 3, kind: input, shape index: {}]   ;;  %s1858_s4 = inlined_call_operand.vmem [shape: f32[2,3,128], index: 4, kind: output, shape index: {}]  }
   0x1 LB: > { %s1164_s16 = sadd.s32 4294967295, %s1201_s15   ;;  %p1168_p0 = scmp.ge.s32.totalorder %s1201_s15, 1  ;;  %s1201_s15 = sphi %s1230_s15, %s14_s15  }
   0x2   : > { %p162_p1 = scmp.lt.s32.totalorder %s1201_s15, 3 }
   0x4   : > { %p163_p2 = pnand %p1168_p0, %p162_p1 }
   0x6   : > { %166 = sbr.rel (%p163_p2) target bundleno = 258 (0x102), region = 36 }
   0xd   : > { %p187_p3 = scmp.lt.s32.totalorder %s1164_s16, 1  ;;  %s1203_s21 = smov 112   ;;  %v264_v15 = vlaneseq  ;;  %v1361_v20 = vld [vmem:[%s1855_s1] sm:$0xff]  ;;  %vm360_vm0 = vcmask 1043456   ;;  %v1386_v38 = vld [vmem:[%s1855_s1 + $0x8] sm:$0xff]  ;;  %vm1106_vm3 = vcmask 1040384  }
   0xe   : > { %s1204_s22 = smov 127   ;;  %vm1108_vm4 = vcmask 1041408  }
   0xf   : > { %s1901_s16 = smov (!%p187_p3, %s1164_s16), 1  ;;  %v265_v17 = vshrl.u32 %v264_v15, 7  ;;  %v1402_v49 = vand.u32 127, %v264_v15 }
  0x10   : > { %s1174_s17 = sshll.u32 %s1901_s16, 6  ;;  %s1171_s9 = sshll.u32 %s1901_s16, 2 }
  0x11   : > { %s1244_s20 = scalar_lea.vmem %s1854_s0, %s1174_s17  ;;  %v1363_v21 = vsub.s32 0, %v265_v17  ;;  %v1365_v22 = vsub.s32 1, %v265_v17  ;;  %v1373_v30 = vsub.s32 2, %v265_v17  ;;  %v1381_v36 = vsub.s32 3, %v265_v17  ;;  %s195_s12 = scalar_lea.vmem %s1858_s4, %s1171_s9 }
  0x12   : > { %v1247_v0 = vld [vmem:[%s1244_s20 + $0x8] sm:$0xff]  ;;  %v1250_v1 = vld [vmem:[%s1244_s20] sm:$0xff]  ;;  %v1277_v4 = vld [vmem:[%s1244_s20 + $0x10] sm:$0xff]  ;;  %v1404_v50 = vsub.s32 4, %v265_v17  ;;  %vm524_vm1 = vcmp.lt.s32.totalorder %v1402_v49, 112  ;;  %vm832_vm2 = vcmp.lt.s32.totalorder %v1402_v49, 127 }
  0x13   : > { %494 = vrot.lane.b32.xlu1 %v1247_v0, %s1203_s21  ;;  %490 = vrot.lane.b32.xlu0 %v1250_v1, %s1203_s21  ;;  %v1258_v2 = vcombine.high %v1250_v1, %v1250_v1  ;;  %v1270_v3 = vcombine.high %v1247_v0, %v1247_v0  ;;  %v1285_v5 = vcombine.high %v1277_v4, %v1277_v4  ;;  %v1292_v6 = vld [vmem:[%s1244_s20 + $0x18] sm:$0xff]  ;;  %v1307_v8 = vld [vmem:[%s1244_s20 + $0x20] sm:$0xff] }
  0x14   : > { %v1300_v7 = vcombine.high %v1292_v6, %v1292_v6  ;;  %v1315_v9 = vcombine.high %v1307_v8, %v1307_v8  ;;  %v1322_v10 = vld [vmem:[%s1244_s20 + $0x28] sm:$0xff]  ;;  %v202_v12 = vld [vmem:[%s1244_s20 + $0x30] sm:$0xff]  ;;  %v203_v14 = vld [vmem:[%s1244_s20 + $0x38] sm:$0xff]  ;;  %v230_v18 = vsub.f32 %v1247_v0, %v1250_v1  ;;  %v267_v24 = vrot.slane %v1361_v20, %v1363_v21 }
  0x15   : > { %v1330_v11 = vcombine.high %v1322_v10, %v1322_v10  ;;  %v1339_v13 = vcombine.high %v202_v12, %v202_v12  ;;  %v1348_v16 = vcombine.high %v203_v14, %v203_v14  ;;  %v231_v19 = vsub.f32 %v1270_v3, %v1258_v2 }
  0x16   : > { %v246_v23 = vmul.f32 %v230_v18, %v230_v18  ;;  %v271_v26 = vrot.slane %v1361_v20, %v1365_v22  ;;  %v232_v27 = vsub.f32 %v1277_v4, %v1247_v0  ;;  %v233_v32 = vsub.f32 %v1285_v5, %v1270_v3 }
  0x17   : > { %800 = vrot.lane.b32.xlu1 %v1250_v1, %s1204_s22  ;;  %492 = vrot.lane.b32.xlu0 %v1258_v2, %s1203_s21  ;;  %v247_v25 = vmul.f32 %v231_v19, %v231_v19  ;;  %v275_v33 = vrot.slane %v1361_v20, %v1373_v30  ;;  %v279_v41 = vrot.slane %v1361_v20, %v1381_v36 }
  0x18   : > { %v344_v28 = vmul.f32 %v267_v24, %v246_v23  ;;  %v248_v31 = vmul.f32 %v232_v27, %v232_v27  ;;  %v249_v37 = vmul.f32 %v233_v32, %v233_v32  ;;  %v234_v42 = vsub.f32 %v1292_v6, %v1277_v4 }
  0x19   : > { %v345_v29 = vmul.f32 %v271_v26, %v247_v25  ;;  %v236_v43 = vsub.f32 %v1307_v8, %v1292_v6  ;;  %v235_v45 = vsub.f32 %v1300_v7, %v1285_v5  ;;  %v237_v46 = vsub.f32 %v1315_v9, %v1300_v7 }
  0x1a   : > { %v361_v34 = vsel %vm360_vm0, %v344_v28, 0.0  ;;  %v346_v40 = vmul.f32 %v275_v33, %v248_v31  ;;  %v238_v47 = vsub.f32 %v1322_v10, %v1307_v8  ;;  %v299_v48 = vrot.slane %v1386_v38, %v1363_v21  ;;  %v1433_v33 = vld [vmem:[%s1856_s2] sm:$0xff] }
  0x1b   : > { %804 = vrot.lane.b32.xlu1 %v1247_v0, %s1204_s22  ;;  %802 = vrot.lane.b32.xlu0 %v1258_v2, %s1204_s22  ;;  %v368_v35 = vsel %vm360_vm0, %v345_v29, 0.0  ;;  %v362_v39 = vrot.slane %v361_v34, 4  ;;  %v303_v51 = vrot.slane %v1386_v38, %v1365_v22  ;;  %v347_v54 = vmul.f32 %v279_v41, %v249_v37 }
  0x1c   : > { %v369_v44 = vrot.slane %v368_v35, 4  ;;  %v375_v53 = vsel %vm360_vm0, %v346_v40, 0.0  ;;  %v250_v55 = vmul.f32 %v234_v42, %v234_v42  ;;  %v252_v56 = vmul.f32 %v236_v43, %v236_v43 }
  0x1d   : > { %v363_v52 = vadd.f32 %v362_v39, %v361_v34  ;;  %v283_v58 = vrot.slane %v1361_v20, %v1404_v50  ;;  %v251_v59 = vmul.f32 %v235_v45, %v235_v45  ;;  %v253_v60 = vmul.f32 %v237_v46, %v237_v46 }
  0x1e   : > { %v370_v57 = vadd.f32 %v369_v44, %v368_v35  ;;  %v240_v61 = vsub.f32 %v202_v12, %v1322_v10  ;;  %v242_v62 = vsub.f32 %v203_v14, %v202_v12  ;;  %v254_v63 = vmul.f32 %v238_v47, %v238_v47 }
  0x1f   : > { %806 = vrot.lane.b32.xlu1 %v1270_v3, %s1204_s22  ;;  %496 = vrot.lane.b32.xlu0 %v1270_v3, %s1203_s21  ;;  %v239_v15 = vsub.f32 %v1330_v11, %v1315_v9  ;;  %v244_v18 = vsub.f32 %v1250_v1, %v203_v14  ;;  %v376_v19 = vrot.slane %v375_v53, 4  ;;  %v241_v23 = vsub.f32 %v1339_v13, %v1330_v11 }
  0x20   : > { %v364_v24 = vrot.slane %v363_v52, 2  ;;  %v382_v25 = vsel %vm360_vm0, %v347_v54, 0.0  ;;  %v1418_v26 = vsub.s32 5, %v265_v17  ;;  %v371_v27 = vrot.slane %v370_v57, 2 }
  0x21   : > { %v348_v28 = vmul.f32 %v283_v58, %v250_v55  ;;  %v1420_v29 = vsub.s32 6, %v265_v17  ;;  %v1424_v31 = vmul.f32 %v240_v61, %v240_v61  ;;  %v1426_v32 = vmul.f32 %v242_v62, %v242_v62 }
  0x22   : > { %v287_v34 = vrot.slane %v1361_v20, %v1418_v26  ;;  %v377_v35 = vadd.f32 %v376_v19, %v375_v53  ;;  %v383_v37 = vrot.slane %v382_v25, 4  ;;  %v255_v41 = vmul.f32 %v239_v15, %v239_v15 }
  0x23   : > { %808 = vrot.lane.b32.xlu1 %v1277_v4, %s1204_s22  ;;  %498 = vrot.lane.b32.xlu0 %v1277_v4, %s1203_s21  ;;  %v291_v39 = vrot.slane %v1361_v20, %v1420_v29  ;;  %v1446_v42 = vmul.f32 %v241_v23, %v241_v23  ;;  %v1448_v43 = vmul.f32 %v244_v18, %v244_v18  ;;  %v389_v53 = vsel %vm360_vm0, %v348_v28, 0.0 }
  0x24   : > { %v352_v44 = vmul.f32 %v299_v48, %v254_v63  ;;  %v365_v45 = vadd.f32 %v364_v24, %v363_v52  ;;  %v578_v46 = vrot.slane %v1433_v33, %v1363_v21  ;;  %v372_v47 = vadd.f32 %v371_v27, %v370_v57 }
  0x25   : > { %v349_v58 = vmul.f32 %v287_v34, %v251_v59  ;;  %v378_v61 = vrot.slane %v377_v35, 2  ;;  %v384_v62 = vadd.f32 %v383_v37, %v382_v25  ;;  %v350_v15 = vmul.f32 %v291_v39, %v252_v56 }
  0x26   : > { %v390_v18 = vrot.slane %v389_v53, 4  ;;  %v366_v19 = vrot.slane %v365_v45, 1  ;;  %v373_v23 = vrot.slane %v372_v47, 1  ;;  %v307_v56 = vrot.slane %v1386_v38, %v1373_v30 }
  0x27   : > { %810 = vrot.lane.b32.xlu1 %v1285_v5, %s1204_s22  ;;  %500 = vrot.lane.b32.xlu0 %v1285_v5, %s1203_s21  ;;  %v396_v27 = vsel %vm360_vm0, %v349_v58, 0.0  ;;  %v379_v28 = vadd.f32 %v378_v61, %v377_v35  ;;  %v403_v34 = vsel %vm360_vm0, %v350_v15, 0.0  ;;  %v353_v35 = vmul.f32 %v303_v51, %v255_v41  ;;  %v1493_v15 = vld [vmem:[%s1857_s3 + $0x8] sm:$0xff] }
  0x28   : > { %v391_v39 = vadd.f32 %v390_v18, %v389_v53  ;;  %v367_v24 = vadd.f32 %v366_v19, %v365_v45  ;;  %v374_v63 = vadd.f32 %v373_v23, %v372_v47  ;;  %v397_v25 = vrot.slane %v396_v27, 4  ;;  %v1500_v51 = vld [vmem:[%s1856_s2 + $0x8] sm:$0xff] }
  0x29   : > { %v404_v58 = vrot.slane %v403_v34, 4  ;;  %v380_v45 = vrot.slane %v379_v28, 1  ;;  %v311_v23 = vrot.slane %v1386_v38, %v1381_v36  ;;  %v354_v53 = vmul.f32 %v307_v56, %v1424_v31 }
  0x2a   : > { %v392_v18 = vrot.slane %v391_v39, 2  ;;  %v398_v61 = vadd.f32 %v397_v25, %v396_v27 }
  0x2b   : > { %812 = vrot.lane.b32.xlu1 %v1292_v6, %s1204_s22  ;;  %502 = vrot.lane.b32.xlu0 %v1292_v6, %s1203_s21  ;;  %v381_v56 = vadd.f32 %v380_v45, %v379_v28  ;;  %v355_v52 = vmul.f32 %v311_v23, %v1446_v42  ;;  %v323_v28 = vrot.slane %v1386_v38, %v1420_v29 }
  0x2c   : > { %v393_v55 = vadd.f32 %v392_v18, %v391_v39  ;;  %v399_v19 = vrot.slane %v398_v61, 2 }
  0x2d   : > { %v438_v39 = vsel %vm360_vm0, %v355_v52, 0.0 }
  0x2e   : > { %v400_v18 = vadd.f32 %v399_v19, %v398_v61 }
  0x2f   : > { %814 = vrot.lane.b32.xlu1 %v1300_v7, %s1204_s22  ;;  %504 = vrot.lane.b32.xlu0 %v1300_v7, %s1203_s21 }
  0x33   : > { %816 = vrot.lane.b32.xlu1 %v1307_v8, %s1204_s22  ;;  %506 = vrot.lane.b32.xlu0 %v1307_v8, %s1203_s21 }
  0x37   : > { %818 = vrot.lane.b32.xlu1 %v1315_v9, %s1204_s22  ;;  %508 = vrot.lane.b32.xlu0 %v1315_v9, %s1203_s21 }
  0x3b   : > { %820 = vrot.lane.b32.xlu1 %v1322_v10, %s1204_s22  ;;  %510 = vrot.lane.b32.xlu0 %v1322_v10, %s1203_s21 }
  0x3f   : > { %822 = vrot.lane.b32.xlu1 %v1330_v11, %s1204_s22  ;;  %512 = vrot.lane.b32.xlu0 %v1330_v11, %s1203_s21 }
  0x43   : > { %824 = vrot.lane.b32.xlu1 %v202_v12, %s1204_s22  ;;  %514 = vrot.lane.b32.xlu0 %v202_v12, %s1203_s21  ;;  %v1422_v12 = vsub.s32 7, %v265_v17  ;;  %v1440_v17 = vld [vmem:[%s1857_s3] sm:$0xff] }
  0x45   : > { %v295_v40 = vrot.slane %v1361_v20, %v1422_v12  ;;  %v431_v20 = vsel %vm360_vm0, %v354_v53, 0.0  ;;  %v327_v52 = vrot.slane %v1386_v38, %v1422_v12 }
  0x47   : > { %826 = vrot.lane.b32.xlu1 %v1339_v13, %s1204_s22  ;;  %516 = vrot.lane.b32.xlu0 %v1339_v13, %s1203_s21  ;;  %v351_v48 = vmul.f32 %v295_v40, %v253_v60  ;;  %v417_v60 = vsel %vm360_vm0, %v352_v44, 0.0  ;;  %v405_v40 = vadd.f32 %v404_v58, %v403_v34  ;;  %v473_v34 = vadd.f32 %v374_v63, %v367_v24 }
  0x48   : > { %v418_v41 = vrot.slane %v417_v60, 4  ;;  %v245_v63 = vsub.f32 %v1258_v2, %v1348_v16  ;;  %v394_v24 = vrot.slane %v393_v55, 1 }
  0x49   : > { %v410_v37 = vsel %vm360_vm0, %v351_v48, 0.0  ;;  %v424_v48 = vsel %vm360_vm0, %v353_v35, 0.0 }
  0x4a   : > { %v411_v44 = vrot.slane %v410_v37, 4  ;;  %v419_v27 = vadd.f32 %v418_v41, %v417_v60  ;;  %v425_v35 = vrot.slane %v424_v48, 4  ;;  %v406_v60 = vrot.slane %v405_v40, 2 }
  0x4b   : > { %828 = vrot.lane.b32.xlu1 %v203_v14, %s1204_s22  ;;  %518 = vrot.lane.b32.xlu0 %v203_v14, %s1203_s21  ;;  %v243_v14 = vsub.f32 %v1348_v16, %v1339_v13  ;;  %v432_v41 = vrot.slane %v431_v20, 4  ;;  %v261_v19 = vmul.f32 %v245_v63, %v245_v63 }
  0x4c   : > { %v412_v57 = vadd.f32 %v411_v44, %v410_v37  ;;  %v420_v45 = vrot.slane %v419_v27, 2  ;;  %v407_v44 = vadd.f32 %v406_v60, %v405_v40 }
  0x4d   : > { %v1453_v54 = vmul.f32 %v243_v14, %v243_v14  ;;  %v385_v14 = vrot.slane %v384_v62, 2 }
  0x4e   : > { %v413_v58 = vrot.slane %v412_v57, 2 }
  0x4f   : > { %830 = vrot.lane.b32.xlu1 %v1348_v16, %s1204_s22  ;;  %520 = vrot.lane.b32.xlu0 %v1348_v16, %s1203_s21  ;;  %v386_v47 = vadd.f32 %v385_v14, %v384_v62  ;;  %v315_v14 = vrot.slane %v1386_v38, %v1404_v50  ;;  %v319_v62 = vrot.slane %v1386_v38, %v1418_v26 }
  0x51   : > { %v387_v25 = vrot.slane %v386_v47, 1  ;;  %v356_v59 = vmul.f32 %v315_v14, %v1426_v32  ;;  %v357_v53 = vmul.f32 %v319_v62, %v1453_v54  ;;  %v426_v32 = vadd.f32 %v425_v35, %v424_v48 }
  0x52   : > { %v474_v14 = vadd.f32 %v473_v34, %v381_v56  ;;  %v414_v54 = vadd.f32 %v413_v58, %v412_v57  ;;  %v421_v48 = vadd.f32 %v420_v45, %v419_v27  ;;  %v433_v62 = vadd.f32 %v432_v41, %v431_v20 }
  0x53   : > { %v388_v42 = vadd.f32 %v387_v25, %v386_v47  ;;  %v445_v23 = vsel %vm360_vm0, %v356_v59, 0.0  ;;  %v358_v25 = vmul.f32 %v323_v28, %v1448_v43  ;;  %v439_v35 = vrot.slane %v438_v39, 4 }
  0x54   : > { %v427_v37 = vrot.slane %v426_v32, 2  ;;  %v446_v61 = vrot.slane %v445_v23, 4  ;;  %v452_v59 = vsel %vm360_vm0, %v357_v53, 0.0  ;;  %v395_v34 = vadd.f32 %v394_v24, %v393_v55 }
  0x55   : > { %v401_v47 = vrot.slane %v400_v18, 1  ;;  %v475_v31 = vadd.f32 %v474_v14, %v388_v42  ;;  %v408_v20 = vrot.slane %v407_v44, 1  ;;  %v459_v57 = vsel %vm360_vm0, %v358_v25, 0.0 }
  0x56   : > { %v415_v40 = vrot.slane %v414_v54, 1  ;;  %v434_v27 = vrot.slane %v433_v62, 2  ;;  %v440_v28 = vadd.f32 %v439_v35, %v438_v39  ;;  %v453_v60 = vrot.slane %v452_v59, 4 }
  0x57   : > { %v422_v42 = vrot.slane %v421_v48, 1  ;;  %v428_v45 = vadd.f32 %v427_v37, %v426_v32  ;;  %v447_v41 = vadd.f32 %v446_v61, %v445_v23  ;;  %v359_v53 = vmul.f32 %v327_v52, %v261_v19 }
  0x58   : > { %v402_v24 = vadd.f32 %v401_v47, %v400_v18  ;;  %v460_v14 = vrot.slane %v459_v57, 4  ;;  %v476_v38 = vadd.f32 %v475_v31, %v395_v34  ;;  %v409_v43 = vadd.f32 %v408_v20, %v407_v44 }
  0x59   : > { %v416_v56 = vadd.f32 %v415_v40, %v414_v54  ;;  %v435_v37 = vadd.f32 %v434_v27, %v433_v62  ;;  %v441_v32 = vrot.slane %v440_v28, 2  ;;  %v454_v23 = vadd.f32 %v453_v60, %v452_v59 }
  0x5a   : > { %v423_v18 = vadd.f32 %v422_v42, %v421_v48  ;;  %v429_v47 = vrot.slane %v428_v45, 1  ;;  %v448_v31 = vrot.slane %v447_v41, 2  ;;  %v466_v19 = vsel %vm360_vm0, %v359_v53, 0.0 }
  0x5b   : > { %v461_v54 = vadd.f32 %v460_v14, %v459_v57  ;;  %v477_v62 = vadd.f32 %v476_v38, %v402_v24  ;;  %v436_v27 = vrot.slane %v435_v37, 1  ;;  %v1576_v60 = vadd.f32 %v441_v32, %v440_v28 }
  0x5c   : > { %v455_v42 = vrot.slane %v454_v23, 2  ;;  %v467_v53 = vrot.slane %v466_v19, 4  ;;  %v430_v38 = vadd.f32 %v429_v47, %v428_v45  ;;  %v1578_v24 = vadd.f32 %v448_v31, %v447_v41 }
  0x5d   : > { %v478_v40 = vadd.f32 %v477_v62, %v409_v43  ;;  %v1863_v32 = vrot.slane %v1433_v33, %v1365_v22  ;;  %v1593_v47 = vadd.f32 %v436_v27, %v435_v37  ;;  %v443_v31 = vrot.slane %v1576_v60, 1 }
  0x5e   : > { %v1865_v27 = vrot.slane %v1440_v17, %v1365_v22 }
  0x5f   : > { %v479_v37 = vadd.f32 %v478_v40, %v416_v56 }
  0x85   : > { %v1549_v58 = vpop.permute.xlu1 %494  ;;  %v1551_v55 = vpop.permute.xlu0 %490 }
  0x86   : > { %1862 = vst [vmem:[#allocation2_spill] sm:$0xff] %v1551_v55 }
  0x89   : > { %v1561_v52 = vpop.permute.xlu1 %800  ;;  %v493_v61 = vpop.permute.xlu0 %492 }
  0x8a   : > { %v538_v34 = vsel %vm524_vm1, %v493_v61, %v1549_v58  ;;  %v539_v44 = vsel %vm524_vm1, %v1551_v55, %v493_v61 }
  0x8b   : > { %v541_v59 = vsub.f32 %v539_v44, %v1250_v1  ;;  %v542_v20 = vsub.f32 %v538_v34, %v1258_v2  ;;  %v462_v44 = vrot.slane %v461_v54, 2 }
  0x8d   : > { %v557_v35 = vmul.f32 %v541_v59, %v541_v59  ;;  %v558_v39 = vmul.f32 %v542_v20, %v542_v20  ;;  %v805_v61 = vpop.permute.xlu1 %804  ;;  %v803_v57 = vpop.permute.xlu0 %802  ;;  %v1596_v20 = vadd.f32 %v455_v42, %v454_v23  ;;  %v1864_v23 = vrot.slane %v1440_v17, %v1363_v21 }
  0x8e   : > { %v846_v14 = vsel %vm832_vm2, %v803_v57, %v805_v61  ;;  %v847_v34 = vsel %vm832_vm2, %v1561_v52, %v803_v57  ;;  %v468_v57 = vadd.f32 %v467_v53, %v466_v19 }
  0x8f   : > { %v655_v28 = vmul.f32 %v578_v46, %v557_v35  ;;  %v656_v59 = vmul.f32 %v1863_v32, %v558_v39  ;;  %v849_v45 = vsub.f32 %v847_v34, %v1250_v1  ;;  %v850_v41 = vsub.f32 %v846_v14, %v1258_v2 }
  0x90   : > { %v463_v32 = vadd.f32 %v462_v44, %v461_v54 }
  0x91   : > { %v671_v43 = vsel %vm360_vm0, %v655_v28, 0.0  ;;  %v678_v62 = vsel %vm360_vm0, %v656_v59, 0.0  ;;  %v865_v46 = vmul.f32 %v849_v45, %v849_v45  ;;  %v866_v35 = vmul.f32 %v850_v41, %v850_v41  ;;  %v807_v48 = vpop.permute.xlu1 %806  ;;  %v497_v25 = vpop.permute.xlu0 %496 }
  0x92   : > { %v672_v39 = vrot.slane %v671_v43, 4  ;;  %v845_v1 = vsel %vm832_vm2, %v805_v61, %v807_v48  ;;  %v537_v2 = vsel %vm524_vm1, %v1549_v58, %v497_v25  ;;  %v679_v28 = vrot.slane %v678_v62, 4 }
  0x93   : > { %v963_v19 = vmul.f32 %v1864_v23, %v865_v46  ;;  %v964_v42 = vmul.f32 %v1865_v27, %v866_v35  ;;  %v851_v53 = vsub.f32 %v845_v1, %v1247_v0  ;;  %v543_v14 = vsub.f32 %v537_v2, %v1247_v0 }
  0x94   : > { %v673_v34 = vadd.f32 %v672_v39, %v671_v43  ;;  %v450_v61 = vrot.slane %v1578_v24, 1  ;;  %v469_v35 = vrot.slane %v468_v57, 2  ;;  %v480_v27 = vadd.f32 %v479_v37, %v423_v18 }
  0x95   : > { %v979_v58 = vsel %vm360_vm0, %v963_v19, 0.0  ;;  %v986_v56 = vsel %vm360_vm0, %v964_v42, 0.0  ;;  %v867_v40 = vmul.f32 %v851_v53, %v851_v53  ;;  %v559_v59 = vmul.f32 %v543_v14, %v543_v14  ;;  %v809_v45 = vpop.permute.xlu1 %808  ;;  %v499_v41 = vpop.permute.xlu0 %498 }
  0x96   : > { %v980_v46 = vrot.slane %v979_v58, 4  ;;  %v987_v23 = vrot.slane %v986_v56, 4  ;;  %v1866_v0 = vrot.slane %v1440_v17, %v1373_v30  ;;  %v1867_v39 = vrot.slane %v1433_v33, %v1373_v30 }
  0x97   : > { %v844_v44 = vsel %vm832_vm2, %v807_v48, %v809_v45  ;;  %v536_v1 = vsel %vm524_vm1, %v497_v25, %v499_v41  ;;  %v674_v2 = vrot.slane %v673_v34, 2  ;;  %v680_v19 = vadd.f32 %v679_v28, %v678_v62 }
  0x98   : > { %v965_v43 = vmul.f32 %v1866_v0, %v867_v40  ;;  %v657_v54 = vmul.f32 %v1867_v39, %v559_v59  ;;  %v981_v42 = vadd.f32 %v980_v46, %v979_v58  ;;  %v988_v53 = vadd.f32 %v987_v23, %v986_v56 }
  0x99   : > { %v852_v14 = vsub.f32 %v844_v44, %v1270_v3  ;;  %v544_v40 = vsub.f32 %v536_v1, %v1270_v3  ;;  %v811_v0 = vpop.permute.xlu1 %810  ;;  %v444_v39 = vadd.f32 %v443_v31, %v1576_v60  ;;  %v457_v48 = vrot.slane %v1596_v20, 1  ;;  %v501_v58 = vpop.permute.xlu0 %500 }
  0x9a   : > { %v993_v18 = vsel %vm360_vm0, %v965_v43, 0.0  ;;  %v685_v37 = vsel %vm360_vm0, %v657_v54, 0.0  ;;  %v982_v59 = vrot.slane %v981_v42, 2  ;;  %v481_v63 = vadd.f32 %v480_v27, %v430_v38 }
  0x9b   : > { %v989_v25 = vrot.slane %v988_v53, 2  ;;  %v994_v55 = vrot.slane %v993_v18, 4  ;;  %v868_v62 = vmul.f32 %v852_v14, %v852_v14  ;;  %v560_v28 = vmul.f32 %v544_v40, %v544_v40 }
  0x9c   : > { %v686_v56 = vrot.slane %v685_v37, 4  ;;  %v1633_v46 = vadd.f32 %v450_v61, %v1578_v24  ;;  %v464_v23 = vrot.slane %v463_v32, 1  ;;  %v1635_v43 = vadd.f32 %v469_v35, %v468_v57 }
  0x9d   : > { %v675_v3 = vadd.f32 %v674_v2, %v673_v34  ;;  %v681_v54 = vrot.slane %v680_v19, 2  ;;  %v1869_v60 = vrot.slane %v1440_v17, %v1381_v36  ;;  %v1870_v38 = vrot.slane %v1433_v33, %v1381_v36  ;;  %v813_v14 = vpop.permute.xlu1 %812 }
  0x9e   : > { %1868 = vst [vmem:[#allocation3_spill] sm:$0xff] %v1635_v43  ;;  %v983_v44 = vadd.f32 %v982_v59, %v981_v42  ;;  %v843_v1 = vsel %vm832_vm2, %v809_v45, %v811_v0  ;;  %v1646_v24 = vadd.f32 %v457_v48, %v1596_v20  ;;  %v482_v57 = vadd.f32 %v481_v63, %v1593_v47  ;;  %v503_v63 = vpop.permute.xlu0 %502 }
  0x9f   : > { %v966_v31 = vmul.f32 %v1869_v60, %v868_v62  ;;  %v658_v27 = vmul.f32 %v1870_v38, %v560_v28  ;;  %v990_v34 = vadd.f32 %v989_v25, %v988_v53  ;;  %v995_v61 = vadd.f32 %v994_v55, %v993_v18 }
  0xa0   : > { %v687_v40 = vadd.f32 %v686_v56, %v685_v37  ;;  %v1651_v60 = vadd.f32 %v464_v23, %v463_v32  ;;  %v676_v59 = vrot.slane %v675_v3, 1  ;;  %v682_v45 = vadd.f32 %v681_v54, %v680_v19 }
  0xa1   : > { %v1000_v35 = vsel %vm360_vm0, %v966_v31, 0.0  ;;  %v692_v2 = vsel %vm360_vm0, %v658_v27, 0.0  ;;  %v853_v28 = vsub.f32 %v843_v1, %v1277_v4  ;;  %v535_v20 = vsel %vm524_vm1, %v499_v41, %v501_v58  ;;  %v815_v31 = vpop.permute.xlu1 %814 }
  0xa2   : > { %v1001_v62 = vrot.slane %v1000_v35, 4  ;;  %1871 = vst [vmem:[#allocation4_spill] sm:$0xff] %v1651_v60  ;;  %v984_v47 = vrot.slane %v983_v44, 1  ;;  %v693_v55 = vrot.slane %v692_v2, 4  ;;  %v545_v53 = vsub.f32 %v535_v20, %v1277_v4 }
  0xa3   : > { %v1658_v18 = vadd.f32 %v482_v57, %v444_v39  ;;  %v991_v37 = vrot.slane %v990_v34, 1  ;;  %v996_v48 = vrot.slane %v995_v61, 2  ;;  %v869_v32 = vmul.f32 %v853_v28, %v853_v28 }
  0xa4   : > { %v842_v25 = vsel %vm832_vm2, %v811_v0, %v813_v14  ;;  %v688_v56 = vrot.slane %v687_v40, 2  ;;  %v1002_v19 = vadd.f32 %v1001_v62, %v1000_v35  ;;  %v561_v23 = vmul.f32 %v545_v53, %v545_v53  ;;  %v505_v53 = vpop.permute.xlu0 %504 }
  0xa5   : > { %v854_v54 = vsub.f32 %v842_v25, %v1285_v5  ;;  %v1663_v41 = vadd.f32 %v676_v59, %v675_v3  ;;  %v683_v38 = vrot.slane %v682_v45, 1  ;;  %v1872_v4 = vrot.slane %v1440_v17, %v1404_v50 }
  0xa6   : > { %v534_v27 = vsel %vm524_vm1, %v501_v58, %v503_v63  ;;  %v985_v1 = vadd.f32 %v984_v47, %v983_v44  ;;  %v694_v57 = vadd.f32 %v693_v55, %v692_v2  ;;  %v1873_v0 = vrot.slane %v1433_v33, %v1404_v50 }
  0xa7   : > { %v967_v39 = vmul.f32 %v1872_v4, %v869_v32  ;;  %v870_v62 = vmul.f32 %v854_v54, %v854_v54  ;;  %v992_v28 = vadd.f32 %v991_v37, %v990_v34  ;;  %v997_v20 = vadd.f32 %v996_v48, %v995_v61  ;;  %v817_v48 = vpop.permute.xlu1 %816 }
  0xa8   : > { %v659_v35 = vmul.f32 %v1873_v0, %v561_v23  ;;  %v546_v59 = vsub.f32 %v534_v27, %v1285_v5  ;;  %v689_v25 = vadd.f32 %v688_v56, %v687_v40  ;;  %v1003_v42 = vrot.slane %v1002_v19, 2 }
  0xa9   : > { %v1007_v3 = vsel %vm360_vm0, %v967_v39, 0.0  ;;  %v1874_v44 = vrot.slane %v1440_v17, %v1418_v26  ;;  %v841_v34 = vsel %vm832_vm2, %v813_v14, %v815_v31  ;;  %v684_v61 = vadd.f32 %v683_v38, %v682_v45 }
  0xaa   : > { %v1008_v32 = vrot.slane %v1007_v3, 4  ;;  %v699_v4 = vsel %vm360_vm0, %v659_v35, 0.0  ;;  %v562_v47 = vmul.f32 %v546_v59, %v546_v59  ;;  %v695_v55 = vrot.slane %v694_v57, 2 }
  0xab   : > { %v700_v58 = vrot.slane %v699_v4, 4  ;;  %v968_v2 = vmul.f32 %v1874_v44, %v870_v62  ;;  %v855_v5 = vsub.f32 %v841_v34, %v1292_v6  ;;  %v1091_v40 = vadd.f32 %v992_v28, %v985_v1  ;;  %v507_v1 = vpop.permute.xlu0 %506 }
  0xac   : > { %v1009_v37 = vadd.f32 %v1008_v32, %v1007_v3  ;;  %v1875_v23 = vrot.slane %v1433_v33, %v1418_v26  ;;  %v533_v39 = vsel %vm524_vm1, %v503_v63, %v505_v53  ;;  %v998_v27 = vrot.slane %v997_v20, 1 }
  0xad   : > { %v1014_v56 = vsel %vm360_vm0, %v968_v2, 0.0  ;;  %v1004_v0 = vadd.f32 %v1003_v42, %v1002_v19  ;;  %v701_v35 = vadd.f32 %v700_v58, %v699_v4  ;;  %v690_v45 = vrot.slane %v689_v25, 1 }
  0xae   : > { %v660_v54 = vmul.f32 %v1875_v23, %v562_v47  ;;  %v1015_v14 = vrot.slane %v1014_v56, 4  ;;  %v871_v62 = vmul.f32 %v855_v5, %v855_v5  ;;  %v547_v3 = vsub.f32 %v533_v39, %v1292_v6 }
  0xaf   : > { %v696_v28 = vadd.f32 %v695_v55, %v694_v57  ;;  %v1010_v59 = vrot.slane %v1009_v37, 2  ;;  %v840_v44 = vsel %vm832_vm2, %v815_v31, %v817_v48  ;;  %v1876_v63 = vrot.slane %v1440_v17, %v1420_v29  ;;  %v819_v57 = vpop.permute.xlu1 %818 }
  0xb0   : > { %v706_v38 = vsel %vm360_vm0, %v660_v54, 0.0  ;;  %v1016_v2 = vadd.f32 %v1015_v14, %v1014_v56  ;;  %v563_v19 = vmul.f32 %v547_v3, %v547_v3  ;;  %v856_v4 = vsub.f32 %v840_v44, %v1300_v7 }
  0xb1   : > { %v707_v32 = vrot.slane %v706_v38, 4  ;;  %v969_v42 = vmul.f32 %v1876_v63, %v871_v62  ;;  %v999_v58 = vadd.f32 %v998_v27, %v997_v20  ;;  %v1005_v47 = vrot.slane %v1004_v0, 1 }
  0xb2   : > { %v702_v34 = vrot.slane %v701_v35, 2  ;;  %v532_v6 = vsel %vm524_vm1, %v505_v53, %v507_v1  ;;  %v1877_v31 = vrot.slane %v1433_v33, %v1420_v29  ;;  %v872_v23 = vmul.f32 %v856_v4, %v856_v4 }
  0xb3   : > { %v708_v55 = vadd.f32 %v707_v32, %v706_v38  ;;  %v1021_v5 = vsel %vm360_vm0, %v969_v42, 0.0  ;;  %v691_v54 = vadd.f32 %v690_v45, %v689_v25  ;;  %v697_v39 = vrot.slane %v696_v28, 1  ;;  %v509_v32 = vpop.permute.xlu0 %508  ;;  %v821_v43 = vpop.permute.xlu1 %820 }
  0xb4   : > { %v661_v56 = vmul.f32 %v1877_v31, %v563_v19  ;;  %v1011_v14 = vadd.f32 %v1010_v59, %v1009_v37  ;;  %v1022_v62 = vrot.slane %v1021_v5, 4  ;;  %v1017_v3 = vrot.slane %v1016_v2, 2 }
  0xb5   : > { %v1878_v27 = vrot.slane %v1440_v17, %v1422_v12  ;;  %v548_v38 = vsub.f32 %v532_v6, %v1300_v7  ;;  %v783_v44 = vadd.f32 %v684_v61, %v1663_v41  ;;  %v1006_v63 = vadd.f32 %v1005_v47, %v1004_v0 }
  0xb6   : > { %v713_v20 = vsel %vm360_vm0, %v661_v56, 0.0  ;;  %v703_v42 = vadd.f32 %v702_v34, %v701_v35  ;;  %v1023_v19 = vadd.f32 %v1022_v62, %v1021_v5  ;;  %v1092_v4 = vadd.f32 %v1091_v40, %v999_v58 }
  0xb7   : > { %v970_v53 = vmul.f32 %v1878_v27, %v872_v23  ;;  %v709_v25 = vrot.slane %v708_v55, 2  ;;  %v564_v45 = vmul.f32 %v548_v38, %v548_v38  ;;  %v784_v59 = vadd.f32 %v783_v44, %v691_v54  ;;  %v511_v5 = vpop.permute.xlu0 %510  ;;  %v823_v44 = vpop.permute.xlu1 %822 }
  0xb8   : > { %v698_v31 = vadd.f32 %v697_v39, %v696_v28  ;;  %v1012_v56 = vrot.slane %v1011_v14, 1  ;;  %v714_v60 = vrot.slane %v713_v20, 4  ;;  %v1018_v17 = vadd.f32 %v1017_v3, %v1016_v2 }
  0xb9   : > { %v1028_v37 = vsel %vm360_vm0, %v970_v53, 0.0  ;;  %v1879_v7 = vrot.slane %v1433_v33, %v1422_v12  ;;  %v839_v41 = vsel %vm832_vm2, %v817_v48, %v819_v57  ;;  %v531_v61 = vsel %vm524_vm1, %v507_v1, %v509_v32 }
  0xba   : > { %v1093_v40 = vadd.f32 %v1092_v4, %v1006_v63  ;;  %v704_v0 = vrot.slane %v703_v42, 1  ;;  %v1024_v35 = vrot.slane %v1023_v19, 2  ;;  %v1029_v58 = vrot.slane %v1028_v37, 4 }
  0xbb   : > { %v662_v6 = vmul.f32 %v1879_v7, %v564_v45  ;;  %v710_v47 = vadd.f32 %v709_v25, %v708_v55  ;;  %v857_v34 = vsub.f32 %v839_v41, %v1307_v8  ;;  %v549_v2 = vsub.f32 %v531_v61, %v1307_v8 }
  0xbc   : > { %v1719_v33 = vadd.f32 %v784_v59, %v698_v31  ;;  %v1013_v23 = vadd.f32 %v1012_v56, %v1011_v14  ;;  %v715_v54 = vadd.f32 %v714_v60, %v713_v20  ;;  %v1019_v39 = vrot.slane %v1018_v17, 1  ;;  %v513_v56 = vpop.permute.xlu0 %512 }
  0xbd   : > { %v720_v28 = vsel %vm360_vm0, %v662_v6, 0.0  ;;  %v873_v62 = vmul.f32 %v857_v34, %v857_v34  ;;  %v565_v1 = vmul.f32 %v549_v2, %v549_v2  ;;  %v838_v3 = vsel %vm832_vm2, %v819_v57, %v821_v43  ;;  %v825_v2 = vpop.permute.xlu1 %824 }
  0xbe   : > { %v721_v48 = vrot.slane %v720_v28, 4  ;;  %v705_v27 = vadd.f32 %v704_v0, %v703_v42  ;;  %v1025_v55 = vadd.f32 %v1024_v35, %v1023_v19  ;;  %v1030_v53 = vadd.f32 %v1029_v58, %v1028_v37 }
  0xbf   : > { %v858_v38 = vsub.f32 %v838_v3, %v1315_v9  ;;  %v711_v63 = vrot.slane %v710_v47, 1  ;;  %v1880_v8 = vrot.slane %v1493_v15, %v1363_v21  ;;  %v1881_v60 = vrot.slane %v1500_v51, %v1363_v21 }
  0xc0   : > { %v530_v20 = vsel %vm524_vm1, %v509_v32, %v511_v5  ;;  %v1094_v25 = vadd.f32 %v1093_v40, %v1013_v23  ;;  %v716_v57 = vrot.slane %v715_v54, 2  ;;  %v722_v42 = vadd.f32 %v721_v48, %v720_v28 }
  0xc1   : > { %v971_v4 = vmul.f32 %v1880_v8, %v873_v62  ;;  %v663_v14 = vmul.f32 %v1881_v60, %v565_v1  ;;  %v874_v19 = vmul.f32 %v858_v38, %v858_v38  ;;  %v1020_v37 = vadd.f32 %v1019_v39, %v1018_v17 }
  0xc2   : > { %v550_v31 = vsub.f32 %v530_v20, %v1315_v9  ;;  %v1026_v7 = vrot.slane %v1025_v55, 1  ;;  %v1031_v6 = vrot.slane %v1030_v53, 2  ;;  %v712_v61 = vadd.f32 %v711_v63, %v710_v47 }
  0xc3   : > { %v1035_v45 = vsel %vm360_vm0, %v971_v4, 0.0  ;;  %v727_v59 = vsel %vm360_vm0, %v663_v14, 0.0  ;;  %v1882_v32 = vrot.slane %v1493_v15, %v1365_v22  ;;  %v837_v17 = vsel %vm832_vm2, %v821_v43, %v823_v44  ;;  %v515_v4 = vpop.permute.xlu0 %514 }
  0xc4   : > { %v1036_v41 = vrot.slane %v1035_v45, 4  ;;  %v728_v21 = vrot.slane %v727_v59, 4  ;;  %v566_v0 = vmul.f32 %v550_v31, %v550_v31  ;;  %v717_v35 = vadd.f32 %v716_v57, %v715_v54 }
  0xc5   : > { %v972_v40 = vmul.f32 %v1882_v32, %v874_v19  ;;  %v723_v58 = vrot.slane %v722_v42, 2  ;;  %v1883_v23 = vrot.slane %v1500_v51, %v1365_v22  ;;  %v859_v47 = vsub.f32 %v837_v17, %v1322_v10 }
  0xc6   : > { %v1037_v28 = vadd.f32 %v1036_v41, %v1035_v45  ;;  %v729_v34 = vadd.f32 %v728_v21, %v727_v59  ;;  %v529_v39 = vsel %vm524_vm1, %v511_v5, %v513_v56  ;;  %v1027_v62 = vadd.f32 %v1026_v7, %v1025_v55  ;;  %v827_v21 = vpop.permute.xlu1 %826 }
  0xc7   : > { %v1042_v9 = vsel %vm360_vm0, %v972_v40, 0.0  ;;  %v664_v48 = vmul.f32 %v1883_v23, %v566_v0  ;;  %v1032_v1 = vadd.f32 %v1031_v6, %v1030_v53  ;;  %v875_v38 = vmul.f32 %v859_v47, %v859_v47 }
  0xc8   : > { %v1038_v3 = vrot.slane %v1037_v28, 2  ;;  %v1043_v43 = vrot.slane %v1042_v9, 4  ;;  %v551_v63 = vsub.f32 %v529_v39, %v1322_v10  ;;  %v836_v8 = vsel %vm832_vm2, %v823_v44, %v825_v2 }
  0xc9   : > { %v734_v54 = vsel %vm360_vm0, %v664_v48, 0.0  ;;  %v718_v22 = vrot.slane %v717_v35, 1  ;;  %v724_v60 = vadd.f32 %v723_v58, %v722_v42  ;;  %v730_v14 = vrot.slane %v729_v34, 2 }
  0xca   : > { %v1044_v20 = vadd.f32 %v1043_v43, %v1042_v9  ;;  %v735_v57 = vrot.slane %v734_v54, 4  ;;  %v1884_v5 = vrot.slane %v1493_v15, %v1373_v30  ;;  %v567_v53 = vmul.f32 %v551_v63, %v551_v63 }
  0xcb   : > { %v860_v19 = vsub.f32 %v836_v8, %v1330_v11  ;;  %v1033_v45 = vrot.slane %v1032_v1, 1  ;;  %v1039_v59 = vadd.f32 %v1038_v3, %v1037_v28  ;;  %v528_v10 = vsel %vm524_vm1, %v513_v56, %v515_v4  ;;  %v517_v3 = vpop.permute.xlu0 %516  ;;  %v1193_v8 = vld [vmem:[%s1244_s20 + $0x30] sm:$0xff] }
  0xcc   : > { %v973_v55 = vmul.f32 %v1884_v5, %v875_v38  ;;  %v1045_v31 = vrot.slane %v1044_v20, 2  ;;  %v736_v44 = vadd.f32 %v735_v57, %v734_v54  ;;  %v1885_v42 = vrot.slane %v1500_v51, %v1373_v30 }
  0xcd   : > { %v876_v41 = vmul.f32 %v860_v19, %v860_v19  ;;  %v786_v32 = vadd.f32 %v1719_v33, %v705_v27  ;;  %v1095_v40 = vadd.f32 %v1094_v25, %v1020_v37  ;;  %v719_v0 = vadd.f32 %v718_v22, %v717_v35 }
  0xce   : > { %v1049_v7 = vsel %vm360_vm0, %v973_v55, 0.0  ;;  %v665_v6 = vmul.f32 %v1885_v42, %v567_v53  ;;  %v725_v17 = vrot.slane %v724_v60, 1  ;;  %v731_v58 = vadd.f32 %v730_v14, %v729_v34  ;;  %v829_v14 = vpop.permute.xlu1 %828 }
  0xcf   : > { %v1886_v56 = vrot.slane %v1493_v15, %v1381_v36  ;;  %v552_v23 = vsub.f32 %v528_v10, %v1330_v11  ;;  %v787_v48 = vadd.f32 %v786_v32, %v712_v61  ;;  %v1040_v30 = vrot.slane %v1039_v59, 1 }
  0xd0   : > { %v741_v28 = vsel %vm360_vm0, %v665_v6, 0.0  ;;  %v1046_v47 = vadd.f32 %v1045_v31, %v1044_v20  ;;  %v1050_v39 = vrot.slane %v1049_v7, 4  ;;  %v1096_v43 = vadd.f32 %v1095_v40, %v1027_v62  ;;  %v519_v31 = vpop.permute.xlu0 %518 }
  0xd1   : > { %v974_v9 = vmul.f32 %v1886_v56, %v876_v41  ;;  %v1034_v33 = vadd.f32 %v1033_v45, %v1032_v1  ;;  %v737_v27 = vrot.slane %v736_v44, 2  ;;  %v568_v25 = vmul.f32 %v552_v23, %v552_v23 }
  0xd2   : > { %v788_v37 = vadd.f32 %v787_v48, %v719_v0  ;;  %v726_v35 = vadd.f32 %v725_v17, %v724_v60  ;;  %v742_v34 = vrot.slane %v741_v28, 4  ;;  %v835_v54 = vsel %vm832_vm2, %v825_v2, %v827_v21  ;;  %v831_v17 = vpop.permute.xlu1 %830 }
  0xd3   : > { %v732_v38 = vrot.slane %v731_v58, 1  ;;  %v1056_v63 = vsel %vm360_vm0, %v974_v9, 0.0  ;;  %v1887_v11 = vrot.slane %v1500_v51, %v1381_v36  ;;  %v861_v22 = vsub.f32 %v835_v54, %v1193_v8 }
  0xd4   : > { %v1041_v62 = vadd.f32 %v1040_v30, %v1039_v59  ;;  %v1047_v1 = vrot.slane %v1046_v47, 1  ;;  %v1051_v20 = vadd.f32 %v1050_v39, %v1049_v7  ;;  %v527_v60 = vsel %vm524_vm1, %v515_v4, %v517_v3 }
  0xd5   : > { %v666_v61 = vmul.f32 %v1887_v11, %v568_v25  ;;  %v1097_v57 = vadd.f32 %v1096_v43, %v1034_v33  ;;  %v738_v5 = vadd.f32 %v737_v27, %v736_v44  ;;  %v877_v55 = vmul.f32 %v861_v22, %v861_v22 }
  0xd6   : > { %v1778_v2 = vadd.f32 %v1658_v18, %v1633_v46  ;;  %v789_v53 = vadd.f32 %v788_v37, %v726_v35  ;;  %v743_v19 = vadd.f32 %v742_v34, %v741_v28  ;;  %v1057_v36 = vrot.slane %v1056_v63, 4 }
  0xd7   : > { %v553_v45 = vsub.f32 %v527_v60, %v1193_v8  ;;  %v733_v10 = vadd.f32 %v732_v38, %v731_v58  ;;  %v748_v59 = vsel %vm360_vm0, %v666_v61, 0.0  ;;  %v1888_v7 = vrot.slane %v1493_v15, %v1404_v50 }
  0xd8   : > { %v834_v4 = vsel %vm832_vm2, %v827_v21, %v829_v14  ;;  %v1098_v44 = vadd.f32 %v1097_v57, %v1041_v62  ;;  %v1048_v6 = vadd.f32 %v1047_v1, %v1046_v47  ;;  %v1052_v41 = vrot.slane %v1051_v20, 2 }
  0xd9   : > { %v975_v42 = vmul.f32 %v1888_v7, %v877_v55  ;;  %v569_v46 = vmul.f32 %v553_v45, %v553_v45  ;;  %v739_v18 = vrot.slane %v738_v5, 1  ;;  %v862_v40 = vsub.f32 %v834_v4, %v1339_v13  ;;  %v1893_v4 = vld [vmem:[#allocation2_spill] sm:$0xff] }
  0xda   : > { %v526_v0 = vsel %vm524_vm1, %v517_v3, %v519_v31  ;;  %v744_v58 = vrot.slane %v743_v19, 2  ;;  %v1058_v28 = vadd.f32 %v1057_v36, %v1056_v63  ;;  %v749_v56 = vrot.slane %v748_v59, 4  ;;  %v521_v63 = vpop.permute.xlu0 %520 }
  0xdb   : > { %v1063_v32 = vsel %vm360_vm0, %v975_v42, 0.0  ;;  %v1790_v23 = vadd.f32 %v789_v53, %v733_v10  ;;  %v1889_v21 = vrot.slane %v1500_v51, %v1404_v50  ;;  %v878_v30 = vmul.f32 %v862_v40, %v862_v40 }
  0xdc   : > { %v1064_v9 = vrot.slane %v1063_v32, 4  ;;  %v554_v47 = vsub.f32 %v526_v0, %v1339_v13  ;;  %v1796_v39 = vadd.f32 %v1098_v44, %v1048_v6  ;;  %v1053_v43 = vadd.f32 %v1052_v41, %v1051_v20 }
  0xdd   : > { %v667_v48 = vmul.f32 %v1889_v21, %v569_v46  ;;  %v833_v3 = vsel %vm832_vm2, %v829_v14, %v831_v17  ;;  %v1800_v27 = vadd.f32 %v739_v18, %v738_v5  ;;  %v1890_v37 = vrot.slane %v1493_v15, %v1418_v26  ;;  %v1194_v14 = vld [vmem:[%s1244_s20 + $0x38] sm:$0xff] }
  0xde   : > { %v1065_v33 = vadd.f32 %v1064_v9, %v1063_v32  ;;  %v570_v35 = vmul.f32 %v554_v47, %v554_v47  ;;  %v745_v34 = vadd.f32 %v744_v58, %v743_v19  ;;  %v1059_v54 = vrot.slane %v1058_v28, 2 }
  0xdf   : > { %v755_v25 = vsel %vm360_vm0, %v667_v48, 0.0  ;;  %v976_v50 = vmul.f32 %v1890_v37, %v878_v30  ;;  %v750_v13 = vadd.f32 %v749_v56, %v748_v59  ;;  %v1891_v61 = vrot.slane %v1500_v51, %v1418_v26 }
  0xe0   : > { %v756_v38 = vrot.slane %v755_v25, 4  ;;  %v848_v22 = vsel %vm832_vm2, %v831_v17, %v1561_v52  ;;  %v863_v62 = vsub.f32 %v833_v3, %v1194_v14  ;;  %v1054_v1 = vrot.slane %v1053_v43, 1 }
  0xe1   : > { %v1070_v11 = vsel %vm360_vm0, %v976_v50, 0.0  ;;  %v668_v8 = vmul.f32 %v1891_v61, %v570_v35  ;;  %v1066_v20 = vrot.slane %v1065_v33, 2  ;;  %v864_v55 = vsub.f32 %v848_v22, %v1348_v16 }
  0xe2   : > { %v757_v60 = vadd.f32 %v756_v38, %v755_v25  ;;  %v1071_v57 = vrot.slane %v1070_v11, 4  ;;  %v879_v53 = vmul.f32 %v863_v62, %v863_v62  ;;  %v525_v19 = vsel %vm524_vm1, %v519_v31, %v521_v63 }
  0xe3   : > { %v762_v5 = vsel %vm360_vm0, %v668_v8, 0.0  ;;  %v746_v26 = vrot.slane %v745_v34, 1  ;;  %v1060_v36 = vadd.f32 %v1059_v54, %v1058_v28  ;;  %v751_v45 = vrot.slane %v750_v13, 2 }
  0xe4   : > { %v1072_v10 = vadd.f32 %v1071_v57, %v1070_v11  ;;  %v763_v59 = vrot.slane %v762_v5, 4  ;;  %v880_v52 = vmul.f32 %v864_v55, %v864_v55  ;;  %v1892_v7 = vrot.slane %v1493_v15, %v1420_v29 }
  0xe5   : > { %v540_v44 = vsel %vm524_vm1, %v521_v63, %v1893_v4  ;;  %v1067_v6 = vadd.f32 %v1066_v20, %v1065_v33  ;;  %v758_v41 = vrot.slane %v757_v60, 2  ;;  %v555_v18 = vsub.f32 %v525_v19, %v1194_v14 }
  0xe6   : > { %v977_v42 = vmul.f32 %v1892_v7, %v879_v53  ;;  %v1073_v46 = vrot.slane %v1072_v10, 2  ;;  %v764_v32 = vadd.f32 %v763_v59, %v762_v5  ;;  %v1894_v31 = vrot.slane %v1493_v15, %v1422_v12 }
  0xe7   : > { %v556_v17 = vsub.f32 %v540_v44, %v1348_v16  ;;  %v1061_v58 = vrot.slane %v1060_v36, 1  ;;  %v752_v28 = vadd.f32 %v751_v45, %v750_v13  ;;  %v571_v48 = vmul.f32 %v555_v18, %v555_v18  ;;  %v1897_v18 = vld [vmem:[#allocation3_spill] sm:$0xff] }
  0xe8   : > { %v978_v40 = vmul.f32 %v1894_v31, %v880_v52  ;;  %v1077_v0 = vsel %vm360_vm0, %v977_v42, 0.0  ;;  %v1074_v56 = vadd.f32 %v1073_v46, %v1072_v10  ;;  %v765_v21 = vrot.slane %v764_v32, 2 }
  0xe9   : > { %v1078_v9 = vrot.slane %v1077_v0, 4  ;;  %v572_v30 = vmul.f32 %v556_v17, %v556_v17  ;;  %v1055_v47 = vadd.f32 %v1054_v1, %v1053_v43  ;;  %v759_v33 = vadd.f32 %v758_v41, %v757_v60 }
  0xea   : > { %v1084_v49 = vsel %vm360_vm0, %v978_v40, 0.0  ;;  %v747_v37 = vadd.f32 %v746_v26, %v745_v34  ;;  %v1068_v15 = vrot.slane %v1067_v6, 1  ;;  %v1895_v50 = vrot.slane %v1500_v51, %v1420_v29  ;;  %v1899_v40 = vld [vmem:[#allocation4_spill] sm:$0xff] }
  0xeb   : > { %v1079_v3 = vadd.f32 %v1078_v9, %v1077_v0  ;;  %v1085_v25 = vrot.slane %v1084_v49, 4  ;;  %v1896_v16 = vrot.slane %v1500_v51, %v1422_v12  ;;  %v753_v13 = vrot.slane %v752_v28, 1 }
  0xec   : > { %v669_v35 = vmul.f32 %v1895_v50, %v571_v48  ;;  %v766_v38 = vadd.f32 %v765_v21, %v764_v32  ;;  %v1062_v61 = vadd.f32 %v1061_v58, %v1060_v36  ;;  %v1075_v8 = vrot.slane %v1074_v56, 1 }
  0xed   : > { %v670_v54 = vmul.f32 %v1896_v16, %v572_v30  ;;  %v1080_v63 = vrot.slane %v1079_v3, 2  ;;  %v1086_v11 = vadd.f32 %v1085_v25, %v1084_v49  ;;  %v760_v34 = vrot.slane %v759_v33, 1 }
  0xee   : > { %v769_v43 = vsel %vm360_vm0, %v669_v35, 0.0  ;;  %v791_v29 = vadd.f32 %v1790_v23, %v1800_v27  ;;  %v1100_v12 = vadd.f32 %v1796_v39, %v1055_v47  ;;  %v1069_v51 = vadd.f32 %v1068_v15, %v1067_v6 }
  0xef   : > { %v776_v22 = vsel %vm360_vm0, %v670_v54, 0.0  ;;  %v1081_v14 = vadd.f32 %v1080_v63, %v1079_v3  ;;  %v1087_v62 = vrot.slane %v1086_v11, 2  ;;  %v770_v1 = vrot.slane %v769_v43, 4 }
  0xf0   : > { %v777_v20 = vrot.slane %v776_v22, 4  ;;  %v754_v60 = vadd.f32 %v753_v13, %v752_v28  ;;  %v767_v57 = vrot.slane %v766_v38, 1  ;;  %v1101_v53 = vadd.f32 %v1100_v12, %v1062_v61 }
  0xf1   : > { %v1082_v5 = vrot.slane %v1081_v14, 1  ;;  %v771_v55 = vadd.f32 %v770_v1, %v769_v43  ;;  %v1076_v19 = vadd.f32 %v1075_v8, %v1074_v56  ;;  %v1088_v26 = vadd.f32 %v1087_v62, %v1086_v11 }
  0xf2   : > { %v778_v36 = vadd.f32 %v777_v20, %v776_v22  ;;  %v792_v45 = vadd.f32 %v791_v29, %v747_v37  ;;  %v761_v10 = vadd.f32 %v760_v34, %v759_v33  ;;  %v485_v59 = vadd.f32 %v1778_v2, %v1646_v24 }
  0xf3   : > { %v772_v52 = vrot.slane %v771_v55, 2  ;;  %v1102_v7 = vadd.f32 %v1101_v53, %v1069_v51  ;;  %v1083_v23 = vadd.f32 %v1082_v5, %v1081_v14  ;;  %v768_v42 = vadd.f32 %v767_v57, %v766_v38 }
  0xf4   : > { %v779_v27 = vrot.slane %v778_v36, 2  ;;  %v793_v39 = vadd.f32 %v792_v45, %v754_v60  ;;  %v1089_v6 = vrot.slane %v1088_v26, 1  ;;  %v1898_v32 = vrot.slane %v1897_v18, 1 }
  0xf5   : > { %v773_v4 = vadd.f32 %v772_v52, %v771_v55  ;;  %v1103_v44 = vadd.f32 %v1102_v7, %v1076_v19  ;;  %v486_v0 = vadd.f32 %v485_v59, %v1899_v40 }
  0xf6   : > { %v780_v41 = vadd.f32 %v779_v27, %v778_v36  ;;  %v794_v46 = vadd.f32 %v793_v39, %v761_v10  ;;  %v472_v31 = vadd.f32 %v1898_v32, %v1897_v18  ;;  %v1090_v56 = vadd.f32 %v1089_v6, %v1088_v26 }
  0xf7   : > { %v774_v17 = vrot.slane %v773_v4, 1  ;;  %v1104_v24 = vadd.f32 %v1103_v44, %v1083_v23 }
  0xf8   : > { %v781_v2 = vrot.slane %v780_v41, 1  ;;  %v795_v58 = vadd.f32 %v794_v46, %v768_v42  ;;  %v487_v9 = vadd.f32 %v486_v0, %v472_v31 }
  0xf9   : > { %v775_v28 = vadd.f32 %v774_v17, %v773_v4  ;;  %v1105_v48 = vadd.f32 %v1104_v24, %v1090_v56 }
  0xfa   : > { %v782_v21 = vadd.f32 %v781_v2, %v780_v41 }
  0xfb   : > { %v796_v49 = vadd.f32 %v795_v58, %v775_v28 }
  0xfd   : > { %v797_v30 = vadd.f32 %v796_v49, %v782_v21 }
  0xff   : > { %v1107_v47 = vsel %vm1106_vm3, %v487_v9, %v797_v30 }
 0x100   : > { %v1109_v33 = vsel %vm1108_vm4, %v1107_v47, %v1105_v48 }
 0x101   : > { %1110 = vst [vmem:[%s195_s12] sm:$0x7] %v1109_v33 }
 0x102 PF: > { %s14_s15 = sadd.s32 1, %s1201_s15  }
 0x103   : > { %p11_p4 = scmp.ge.s32.totalorder %s14_s15, 4  }
 0x105   :  { %13 = sbr.rel (!%p11_p4) target bundleno = 1 (0x1), region = 66 }

</bundles_post_ra>
